<compile_context>
chip_gen: v5e
topology: v5e:2x2
jax: 0.10.0
libtpu: 0.0.40
codegen_flags: <defaults>
</compile_context>

<pallas_src>
import functools

import jax
import jax.numpy as jnp
from jax.experimental import pallas as pl
from jax.experimental.pallas import tpu as pltpu


def _mlp_kernel(x_ref, w1_ref, b1_ref, w2_ref, b2_ref, w3_ref, b3_ref, o_ref):
    # In-kernel bf16 cast of the streamed f32 x tile (VPU; no extra HBM pass).
    x_bf = x_ref[...].astype(jnp.bfloat16)
    # fc1: bf16 MXU operands, f32 accumulation; bias/ReLU on the VPU in f32.
    h1 = jnp.dot(x_bf, w1_ref[...], preferred_element_type=jnp.float32)
    h1 = jnp.maximum(h1 + b1_ref[...], 0.0)
    # dropout (eval) = identity
    # fc2 (outputs zero-padded to 128 so h2 vregs are lane-full).
    h2 = jnp.dot(h1.astype(jnp.bfloat16), w2_ref[...],
                 preferred_element_type=jnp.float32)
    h2 = jnp.maximum(h2 + b2_ref[...], 0.0)
    # dropout (eval) = identity
    # fc3: contract the (8,128) bf16 w3 row block against bf16 h2 along the
    # feature axis ('ok,bk->ob', flash-attention-style transposed-RHS matmul —
    # no XLU transpose of h2). Result lands batch-on-lanes: (8, block_b); row 0
    # is real, rows 1..7 are zero padding. Store is a lane-dense (1, block_b)
    # row (unmasked vst except at the ragged batch boundary).
    logits = jax.lax.dot_general(
        w3_ref[...], h2.astype(jnp.bfloat16), (((1,), (1,)), ((), ())),
        preferred_element_type=jnp.float32)
    out_row = jax.nn.sigmoid(logits[0:1, :] + b3_ref[0, 0])
    o_ref[...] = out_row.astype(o_ref.dtype)


def prepare_params(params):
    """One-time weight prep (hoisted out of the per-call forward path).

    params: PyTorch-layout-equivalent dict with transposed weights
            (in_features, out_features) and (1, out_features) biases.
    """
    n2 = params["w2"].shape[1]
    assert n2 <= 128, "hidden2 > 128 not supported by the fixed fc2 pad"
    w1 = params["w1"].astype(jnp.bfloat16)                        # (D_in, 128)
    b1 = params["b1"].astype(jnp.float32)                         # (1, 128)
    w2 = jnp.pad(params["w2"],
                 ((0, 0), (0, 128 - n2))).astype(jnp.bfloat16)    # (128, 128)
    b2 = jnp.pad(params["b2"],
                 ((0, 0), (0, 128 - n2))).astype(jnp.float32)     # (1, 128)
    # w3 packed as an (8, 128) bf16 row block: row 0 holds fc3 weights, rest 0.
    w3 = params["w3"]                                             # (64, 1)
    w3_row = (jnp.zeros((8, 128), jnp.float32)
              .at[0, : w3.shape[0]].set(w3[:, 0])).astype(jnp.bfloat16)
    b3 = params["b3"].reshape(1, 1).astype(jnp.float32)           # SMEM scalar
    return {"w1": w1, "b1": b1, "w2": w2, "b2": b2, "w3_row": w3_row, "b3": b3}


@functools.partial(jax.jit, static_argnames=("block_b",))
def sentiment_net_forward(x, prepared, *, block_b=None):
    """x: (B, D_in) float32.  prepared: output of prepare_params()."""
    B, D_in = x.shape
    if block_b is None:
        # Big tiles amortize the ~0.35 us per-grid-step overhead, but cap so
        # the grid keeps >= 2 "parallel" steps when possible (v7x: 2 TCs).
        per_core = ((-(-B // 2)) + 127) // 128 * 128   # round_up(cdiv(B,2),128)
        block_b = max(128, min(2048, per_core))
    assert block_b % 128 == 0, "block_b must be a multiple of 128 (lane width)"
    nb = pl.cdiv(B, block_b)

    # Advisory cost estimate so XLA schedules/overlaps the call sensibly.
    weight_bytes = (D_in * 128 + 128 * 128 + 8 * 128) * 2 + (128 + 128 + 1) * 4
    cost = pl.CostEstimate(
        flops=2 * B * (D_in * 128 + 128 * 128 + 128),
        transcendentals=B,
        bytes_accessed=B * (D_in * 4 + 4) + weight_bytes,
    )

    out_row = pl.pallas_call(
        _mlp_kernel,
        out_shape=jax.ShapeDtypeStruct((1, B), jnp.float32),
        grid=(nb,),
        in_specs=[
            pl.BlockSpec((block_b, D_in), lambda i: (i, 0)),      # x (f32, streamed)
            pl.BlockSpec((D_in, 128), lambda i: (0, 0)),          # w1 (resident)
            pl.BlockSpec((1, 128), lambda i: (0, 0)),             # b1
            pl.BlockSpec((128, 128), lambda i: (0, 0)),           # w2 (padded)
            pl.BlockSpec((1, 128), lambda i: (0, 0)),             # b2 (padded)
            pl.BlockSpec((8, 128), lambda i: (0, 0)),             # w3 row block
            pl.BlockSpec(memory_space=pltpu.MemorySpace.SMEM),    # b3 scalar
        ],
        # Lane-dense output: one (1, block_b) row per grid step; the ragged
        # final block relies on Pallas's masked boundary store.
        out_specs=pl.BlockSpec((1, block_b), lambda i: (0, i)),
        compiler_params=pltpu.CompilerParams(
            dimension_semantics=("parallel",),
            # Explicit limit so a tile choice tuned on v5e/v6e (128 MiB) can't
            # silently regress on v7x (64 MiB physical). Usage here is tiny.
            vmem_limit_bytes=32 * 1024 * 1024,
        ),
        cost_estimate=cost,
    )(x, prepared["w1"], prepared["b1"], prepared["w2"], prepared["b2"],
      prepared["w3_row"], prepared["b3"])

    return out_row[0, :][:, None]


def init_params(key, input_dim):
    """PyTorch nn.Linear-style init (uniform +/- 1/sqrt(fan_in)).

    Weights stored transposed, i.e. (in_features, out_features); biases (1, out).
    """
    def linear(k, fan_in, fan_out):
        kw, kb = jax.random.split(k)
        bound = 1.0 / jnp.sqrt(fan_in)
        w = jax.random.uniform(kw, (fan_in, fan_out), jnp.float32, -bound, bound)
        b = jax.random.uniform(kb, (1, fan_out), jnp.float32, -bound, bound)
        return w, b

    k1, k2, k3 = jax.random.split(key, 3)
    w1, b1 = linear(k1, input_dim, 128)
    w2, b2 = linear(k2, 128, 64)
    w3, b3 = linear(k3, 64, 1)
    return {"w1": w1, "b1": b1, "w2": w2, "b2": b2, "w3": w3, "b3": b3}


if __name__ == "__main__":
    key = jax.random.PRNGKey(0)
    k_x, k_p = jax.random.split(key)

    # Ragged batch (exercises the un-padded boundary-masked final block) and an
    # adaptive tile that yields a 2-step "parallel" grid (both v7x TCs busy).
    batch, input_dim = 500, 32
    x = jax.random.normal(k_x, (batch, input_dim), dtype=jnp.float32)
    params = init_params(k_p, input_dim)

    prepared = prepare_params(params)          # one-time weight prep
    out = sentiment_net_forward(x, prepared)   # block_b chosen adaptively
    out = jax.block_until_ready(out)

    # Plain-JAX f32 reference of the same forward pass. Kernel uses bf16 MXU
    # operands (f32 accumulation), so tolerance is loosened accordingly.
    ref = jnp.maximum(x @ params["w1"] + params["b1"], 0.0)
    ref = jnp.maximum(ref @ params["w2"] + params["b2"], 0.0)
    ref = jax.nn.sigmoid(ref @ params["w3"] + params["b3"])
    assert out.shape == (batch, 1)
    err = jnp.max(jnp.abs(out - ref))
    assert jnp.allclose(out, ref, atol=3e-2), f"mismatch vs reference, max err {err}"

    print("KERNEL_OK")
</pallas_src>

<mosaic_0001>
module attributes {stable_mosaic.version = 11 : i64} {
  func.func @_mlp_kernel(%arg0: i32, %arg1: memref<256x32xf32, #tpu.memory_space<vmem>>, %arg2: memref<32x128xbf16, #tpu.memory_space<vmem>>, %arg3: memref<1x128xf32, #tpu.memory_space<vmem>>, %arg4: memref<128x128xbf16, #tpu.memory_space<vmem>>, %arg5: memref<1x128xf32, #tpu.memory_space<vmem>>, %arg6: memref<8x128xbf16, #tpu.memory_space<vmem>>, %arg7: memref<1x1xf32, #tpu.memory_space<smem>>, %arg8: memref<1x256xf32, #tpu.memory_space<vmem>>) attributes {dimension_semantics = [#tpu.dimension_semantics<parallel>], iteration_bounds = array<i64: 2>, scalar_prefetch = 0 : i64, scratch_operands = 0 : i64, tpu.core_type = #tpu.core_type<tc>, window_params = [{transform_indices = @transform_0, window_bounds = array<i64: 256, 32>}, {pipeline_mode = #tpu.pipeline_mode<synchronous>, transform_indices = @transform_1, window_bounds = array<i64: 32, 128>}, {pipeline_mode = #tpu.pipeline_mode<synchronous>, transform_indices = @transform_2, window_bounds = array<i64: 1, 128>}, {pipeline_mode = #tpu.pipeline_mode<synchronous>, transform_indices = @transform_3, window_bounds = array<i64: 128, 128>}, {pipeline_mode = #tpu.pipeline_mode<synchronous>, transform_indices = @transform_4, window_bounds = array<i64: 1, 128>}, {pipeline_mode = #tpu.pipeline_mode<synchronous>, transform_indices = @transform_5, window_bounds = array<i64: 8, 128>}, {transform_indices = @transform_6, window_bounds = array<i64: 1, 1>}, {transform_indices = @transform_7, window_bounds = array<i64: 1, 256>}]} {
    %c0 = arith.constant 0 : index
    %c0_0 = arith.constant 0 : index
    %0 = vector.load %arg1[%c0, %c0_0] : memref<256x32xf32, #tpu.memory_space<vmem>>, vector<256x32xf32>
    %1 = arith.truncf %0 : vector<256x32xf32> to vector<256x32xbf16>
    %c0_1 = arith.constant 0 : index
    %c0_2 = arith.constant 0 : index
    %2 = vector.load %arg2[%c0_1, %c0_2] : memref<32x128xbf16, #tpu.memory_space<vmem>>, vector<32x128xbf16>
    %cst = arith.constant dense<0.000000e+00> : vector<256x128xf32>
    %3 = tpu.matmul %1, %2, %cst {dimension_numbers = #tpu.dot_dimension_numbers<[1], [0], [0], [1], [0, 0, 1, 1], [], []>} : vector<256x32xbf16>, vector<32x128xbf16>, vector<256x128xf32> -> vector<256x128xf32>
    %c0_3 = arith.constant 0 : index
    %c0_4 = arith.constant 0 : index
    %4 = vector.load %arg3[%c0_3, %c0_4] : memref<1x128xf32, #tpu.memory_space<vmem>>, vector<1x128xf32>
    %5 = vector.broadcast %4 : vector<1x128xf32> to vector<256x128xf32>
    %6 = arith.addf %3, %5 : vector<256x128xf32>
    %cst_5 = arith.constant 0.000000e+00 : f32
    %7 = vector.broadcast %cst_5 : f32 to vector<256x128xf32>
    %8 = arith.maximumf %6, %7 : vector<256x128xf32>
    %9 = arith.truncf %8 : vector<256x128xf32> to vector<256x128xbf16>
    %c0_6 = arith.constant 0 : index
    %c0_7 = arith.constant 0 : index
    %10 = vector.load %arg4[%c0_6, %c0_7] : memref<128x128xbf16, #tpu.memory_space<vmem>>, vector<128x128xbf16>
    %cst_8 = arith.constant dense<0.000000e+00> : vector<256x128xf32>
    %11 = tpu.matmul %9, %10, %cst_8 {dimension_numbers = #tpu.dot_dimension_numbers<[1], [0], [0], [1], [0, 0, 1, 1], [], []>} : vector<256x128xbf16>, vector<128x128xbf16>, vector<256x128xf32> -> vector<256x128xf32>
    %c0_9 = arith.constant 0 : index
    %c0_10 = arith.constant 0 : index
    %12 = vector.load %arg5[%c0_9, %c0_10] : memref<1x128xf32, #tpu.memory_space<vmem>>, vector<1x128xf32>
    %13 = vector.broadcast %12 : vector<1x128xf32> to vector<256x128xf32>
    %14 = arith.addf %11, %13 : vector<256x128xf32>
    %cst_11 = arith.constant 0.000000e+00 : f32
    %15 = vector.broadcast %cst_11 : f32 to vector<256x128xf32>
    %16 = arith.maximumf %14, %15 : vector<256x128xf32>
    %c0_12 = arith.constant 0 : index
    %c0_13 = arith.constant 0 : index
    %17 = vector.load %arg6[%c0_12, %c0_13] : memref<8x128xbf16, #tpu.memory_space<vmem>>, vector<8x128xbf16>
    %18 = arith.truncf %16 : vector<256x128xf32> to vector<256x128xbf16>
    %cst_14 = arith.constant dense<0.000000e+00> : vector<8x256xf32>
    %19 = tpu.matmul %17, %18, %cst_14 {dimension_numbers = #tpu.dot_dimension_numbers<[1], [1], [0], [0], [0, 0, 1, 0], [], []>} : vector<8x128xbf16>, vector<256x128xbf16>, vector<8x256xf32> -> vector<8x256xf32>
    %20 = vector.extract_strided_slice %19 {offsets = [0, 0], sizes = [1, 256], strides = [1, 1]} : vector<8x256xf32> to vector<1x256xf32>
    %c0_15 = arith.constant 0 : index
    %c0_16 = arith.constant 0 : index
    %21 = memref.load %arg7[%c0_15, %c0_16] : memref<1x1xf32, #tpu.memory_space<smem>>
    %22 = vector.broadcast %21 : f32 to vector<1x256xf32>
    %23 = arith.addf %20, %22 : vector<1x256xf32>
    %24 = arith.negf %23 : vector<1x256xf32>
    %25 = math.exp %24 : vector<1x256xf32>
    %cst_17 = arith.constant 1.000000e+00 : f32
    %26 = vector.broadcast %cst_17 : f32 to vector<1x256xf32>
    %27 = arith.addf %26, %25 : vector<1x256xf32>
    %28 = arith.divf %26, %27 : vector<1x256xf32>
    %c0_18 = arith.constant 0 : index
    %c0_19 = arith.constant 0 : index
    %29 = vector.load %arg8[%c0_18, %c0_19] : memref<1x256xf32, #tpu.memory_space<vmem>>, vector<1x256xf32>
    tpu.vector_store %arg8[%c0_18, %c0_19], %28 {strides = array<i32>} : memref<1x256xf32, #tpu.memory_space<vmem>>, vector<1x256xf32>,
    return
  }
  func.func @transform_0(%arg0: i32) -> (i32, i32) {
    %c0_i32 = arith.constant 0 : i32
    %c0_i32_0 = arith.constant 0 : i32
    return %arg0, %c0_i32 : i32, i32
  }
  func.func @transform_1(%arg0: i32) -> (i32, i32) {
    %c0_i32 = arith.constant 0 : i32
    %c0_i32_0 = arith.constant 0 : i32
    %c0_i32_1 = arith.constant 0 : i32
    return %c0_i32, %c0_i32_0 : i32, i32
  }
  func.func @transform_2(%arg0: i32) -> (i32, i32) {
    %c0_i32 = arith.constant 0 : i32
    %c0_i32_0 = arith.constant 0 : i32
    %c0_i32_1 = arith.constant 0 : i32
    return %c0_i32, %c0_i32_0 : i32, i32
  }
  func.func @transform_3(%arg0: i32) -> (i32, i32) {
    %c0_i32 = arith.constant 0 : i32
    %c0_i32_0 = arith.constant 0 : i32
    %c0_i32_1 = arith.constant 0 : i32
    return %c0_i32, %c0_i32_0 : i32, i32
  }
  func.func @transform_4(%arg0: i32) -> (i32, i32) {
    %c0_i32 = arith.constant 0 : i32
    %c0_i32_0 = arith.constant 0 : i32
    %c0_i32_1 = arith.constant 0 : i32
    return %c0_i32, %c0_i32_0 : i32, i32
  }
  func.func @transform_5(%arg0: i32) -> (i32, i32) {
    %c0_i32 = arith.constant 0 : i32
    %c0_i32_0 = arith.constant 0 : i32
    %c0_i32_1 = arith.constant 0 : i32
    return %c0_i32, %c0_i32_0 : i32, i32
  }
  func.func @transform_6(%arg0: i32) -> (i32, i32) {
    %c0_i32 = arith.constant 0 : i32
    %c0_i32_0 = arith.constant 0 : i32
    %c0_i32_1 = arith.constant 0 : i32
    return %c0_i32, %c0_i32_0 : i32, i32
  }
  func.func @transform_7(%arg0: i32) -> (i32, i32) {
    %c0_i32 = arith.constant 0 : i32
    %c0_i32_0 = arith.constant 0 : i32
    return %c0_i32, %arg0 : i32, i32
  }
}

</mosaic_0001>

<bundles_post_ra>
// kernel: sentiment_net_forward.1
= control target key start
LH: loop header
LB: loop body
LE: loop exit
PB: predicated region body
PF: predicated region fallthrough
CT: control target
= control target key end

     0   :  { %s1424_s0 = inlined_call_operand.vmem [shape: f32[500,32], index: 0, kind: input, shape index: {}]   ;;  %s1425_s1 = inlined_call_operand.vmem [shape: bf16[32,128], index: 1, kind: input, shape index: {}]   ;;  %s1426_s2 = inlined_call_operand.vmem [shape: f32[1,128], index: 2, kind: input, shape index: {}]   ;;  %s1427_s3 = inlined_call_operand.vmem [shape: bf16[128,128], index: 3, kind: input, shape index: {}]   ;;  %s1428_s4 = inlined_call_operand.vmem [shape: f32[1,128], index: 4, kind: input, shape index: {}]   ;;  %s1429_s5 = inlined_call_operand.vmem [shape: bf16[8,128], index: 5, kind: input, shape index: {}]   ;;  %s1430_s6 = inlined_call_operand.<no memory space> [shape: f32[1,1], index: 6, kind: input, shape index: {}]   ;;  %s1431_s7 = inlined_call_operand.hbm [shape: f32[1,500], index: 7, kind: output, shape index: {}]  }
   0x1   :  { %12 = sst [smem:[#allocation2]] %s1430_s6 }
   0x2   :  { %13 = vsyncpa [#allocation4], 0 }
   0x3   :  { %15 = vsyncpa [#allocation4 + $0x1], 0  ;;  %s1161_s26 = smov 0   ;;  %s1163_s27 = smov 0  }
   0x4   :  { %s1165_s28 = smov 0   ;;  %s1167_s29 = smov 0  }
   0x5 LB: > { %s1182_s6 = sadd.s32 4294967295, %s1116_s29   ;;  %s916_s30 = sadd.s32 4294967294, %s1116_s29   ;;  %s1116_s29 = sphi %s1167_s29, %s1439_s29   ;;  %s1112_s28 = sphi %s1165_s28, %s1438_s28   ;;  %s1108_s27 = sphi %s1163_s27, %s1437_s27   ;;  %s1104_s26 = sphi %s1161_s26, %s1436_s26  }
   0x6   : > { %s1186_s8 = sadd.s32 1, %s1116_s29   ;;  %s180_s9 = sadd.s32 1, %s1112_s28 }
   0x7   : > { %s177_s10 = ssub.s32 %s1116_s29, %s1186_s8  ;;  %p190_p0 = scmp.ne.s32.totalorder %s1112_s28, %s1108_s27 }
   0x8   : > { %p178_p1 = scmp.eq.s32.totalorder %s177_s10, 0  ;;  %p191_p2 = scmp.eq.s32.totalorder %s1182_s6, 1 }
   0x9   : > { %p196_p3 = scmp.ne.s32.totalorder %s1108_s27, %s1104_s26  ;;  %p197_p4 = scmp.eq.s32.totalorder %s916_s30, 1 }
   0xa   : > { %s1197_s11 = scalar_select %p178_p1, %s1112_s28, %s180_s9  }
   0xb   : > { %p1199_p5 = por %p191_p2, %p190_p0  ;;  %p1203_p6 = por %p197_p4, %p196_p3 }
   0xc   : > { %p919_p7 = scmp.ge.s32.totalorder %s1116_s29, 1  ;;  %p250_p8 = scmp.lt.s32.totalorder %s1116_s29, 3 }
   0xe   : > { %p251_p9 = pnand %p919_p7, %p250_p8 }
   0xf   : > { %s921_s16 = sshll.u32 (!%p251_p9), %s1182_s6, 5  ;;  %s788_s15 = sld [smem:[#allocation2]] (!%p251_p9) }
  0x10   : > { %254 = sbr.rel (%p251_p9) target bundleno = 786 (0x312), region = 48  ;;  %p291_p10 = scmp.lt.s32.totalorder (!%p251_p9), %s921_s16, 62 }
  0x11   : > { %s982_s18 = sshll.u32 (!%p251_p9), %s1182_s6, 1  ;;  %s1074_s14 = scalar_lea.hbm (!%p251_p9), %s1431_s7, 4 }
  0x12   : > { %s852_s21 = scalar_lea.hbm (!%p251_p9), %s1431_s7, %s982_s18 }
  0x13   : > { %s856_s24 = sshll.u32 (!%p251_p9), %s852_s21, 4  ;;  %s857_s24 = int_to_ptr.hbm [resolvable:$true] %s856_s24 }
  0x14   : > { %s1068_s30 = sshra.s32 (!%p251_p9), %s857_s24, 4  ;;  %s1069_s30 = int_to_ptr.hbm [resolvable:$true] %s1068_s30 }
  0x15   : > { %v986_v0 = vld [vmem:[%s1425_s1 + $0x8] sm:$0xff]  ;;  %v985_v1 = vld [vmem:[%s1425_s1] sm:$0xff]  ;;  %s1441_s16 = smov (!%p291_p10, %s921_s16), 62  ;;  %vm370_vm0 = vcmask 261120   ;;  %v994_v17 = vld [vmem:[%s1427_s3 + $0x38] sm:$0xff]  ;;  %vm833_vm9 = vcmask 1040384   ;;  %p1075_p0 = scmp.lt.s32.totalorder %s1069_s30, %s1431_s7 }
  0x16   : > { %425 = vmatpush.bf16.msra.mxu0 %v986_v0  ;;  %995 = vmatpush.bf16.msra.mxu3 %v986_v0  ;;  %s922_s19 = sshll.u32 %s1441_s16, 3  ;;  %v993_v21 = vld [vmem:[%s1427_s3 + $0x30] sm:$0xff]  ;;  %v992_v22 = vld [vmem:[%s1427_s3 + $0x28] sm:$0xff]  ;;  %v991_v23 = vld [vmem:[%s1427_s3 + $0x20] sm:$0xff]  ;;  %s283_s16 = sand.u32 1, %s1108_s27  }
  0x17   : > { %s1219_s22 = scalar_lea.vmem %s1424_s0, %s922_s19  ;;  %624 = vmatpush.bf16.msra.mxu1 %v994_v17  ;;  %997 = vmatpush.bf16.msra.mxu2 %v994_v17  ;;  %v990_v26 = vld [vmem:[%s1427_s3 + $0x18] sm:$0xff]  ;;  %v989_v28 = vld [vmem:[%s1427_s3 + $0x10] sm:$0xff]  ;;  %v988_v29 = vld [vmem:[%s1427_s3 + $0x8] sm:$0xff]  ;;  %s1382_s17 = sshll.u32 %s283_s16, 1 }
  0x18   : > { %v302_v2 = vld [vmem:[%s1219_s22] sm:$0xff]  ;;  %v303_v3 = vld [vmem:[%s1219_s22 + $0x8] sm:$0xff]  ;;  %v304_v5 = vld [vmem:[%s1219_s22 + $0x10] sm:$0xff]  ;;  %s285_s6 = scalar_lea.vmem [#allocation3], %s1382_s17  ;;  %s842_s25 = scalar_lea.sflag [#allocation4], %s283_s16 }
  0x19   : > { %v334_v4 = vpack.c.bf16 %v303_v3, %v302_v2  ;;  %v305_v6 = vld [vmem:[%s1219_s22 + $0x18] sm:$0xff]  ;;  %v306_v8 = vld [vmem:[%s1219_s22 + $0x20] sm:$0xff]  ;;  %v307_v9 = vld [vmem:[%s1219_s22 + $0x28] sm:$0xff]  ;;  %s854_s23 = sshll.u32 %s285_s6, 4  ;;  %s855_s23 = int_to_ptr.vmem [resolvable:$true] %s854_s23 }
  0x1a   : > { %426 = vmatpush.bf16.msra.mxu0 %v985_v1  ;;  %996 = vmatpush.bf16.msra.mxu3 %v985_v1  ;;  %v335_v7 = vpack.c.bf16 %v305_v6, %v304_v5  ;;  %v336_v10 = vpack.c.bf16 %v307_v9, %v306_v8  ;;  %v308_v11 = vld [vmem:[%s1219_s22 + $0x30] sm:$0xff]  ;;  %v309_v12 = vld [vmem:[%s1219_s22 + $0x38] sm:$0xff]  ;;  %v310_v14 = vld [vmem:[%s1219_s22 + $0x40] sm:$0xff] }
  0x1b   : > { %v337_v13 = vpack.c.bf16 %v309_v12, %v308_v11  ;;  %v311_v15 = vld [vmem:[%s1219_s22 + $0x48] sm:$0xff]  ;;  %v312_v18 = vld [vmem:[%s1219_s22 + $0x50] sm:$0xff]  ;;  %v313_v19 = vld [vmem:[%s1219_s22 + $0x58] sm:$0xff]  ;;  %625 = vmatpush.bf16.msra.mxu1 %v993_v21  ;;  %998 = vmatpush.bf16.msra.mxu2 %v993_v21 }
  0x1c   : > { %v338_v16 = vpack.c.bf16 %v311_v15, %v310_v14  ;;  %v339_v20 = vpack.c.bf16 %v313_v19, %v312_v18  ;;  %v314_v24 = vld [vmem:[%s1219_s22 + $0x60] sm:$0xff]  ;;  %v315_v25 = vld [vmem:[%s1219_s22 + $0x68] sm:$0xff]  ;;  %v316_v31 = vld [vmem:[%s1219_s22 + $0x70] sm:$0xff] }
  0x1d   : > { %931 = vmatmul.msk.bf16.vlgmr.msra.gmra.mxu0 %vm370_vm0, %v334_v4  ;;  %v340_v27 = vpack.c.bf16 %v315_v25, %v314_v24  ;;  %v987_v30 = vld [vmem:[%s1427_s3] sm:$0xff]  ;;  %v317_v32 = vld [vmem:[%s1219_s22 + $0x78] sm:$0xff]  ;;  %v323_v35 = vld [vmem:[%s1219_s22 + $0xa8] sm:$0xff] }
  0x1e   : > { %v341_v33 = vpack.c.bf16 %v317_v32, %v316_v31  ;;  %v322_v34 = vld [vmem:[%s1219_s22 + $0xa0] sm:$0xff]  ;;  %v319_v38 = vld [vmem:[%s1219_s22 + $0x88] sm:$0xff]  ;;  %v324_v41 = vld [vmem:[%s1219_s22 + $0xb0] sm:$0xff] }
  0x1f   : > { %626 = vmatpush.bf16.msra.mxu1 %v992_v22  ;;  %999 = vmatpush.bf16.msra.mxu2 %v992_v22  ;;  %v344_v36 = vpack.c.bf16 %v323_v35, %v322_v34  ;;  %v318_v37 = vld [vmem:[%s1219_s22 + $0x80] sm:$0xff]  ;;  %v325_v42 = vld [vmem:[%s1219_s22 + $0xb8] sm:$0xff]  ;;  %v320_v50 = vld [vmem:[%s1219_s22 + $0x90] sm:$0xff] }
  0x20   : > { %v342_v39 = vpack.c.bf16 %v319_v38, %v318_v37  ;;  %v1279_v43 = vld [vmem:[%s1426_s2] ss:$0 sm:$0xff]  ;;  %v345_v44 = vpack.c.bf16 %v325_v42, %v324_v41  ;;  %v321_v51 = vld [vmem:[%s1219_s22 + $0x98] sm:$0xff]  ;;  %v327_v56 = vld [vmem:[%s1219_s22 + $0xc8] sm:$0xff] }
  0x21   : > { %941 = vmatmul.msk.bf16.vlgmr.msra.gmra.mxu3 %vm370_vm0, %v344_v36  ;;  %v343_v53 = vpack.c.bf16 %v321_v51, %v320_v50  ;;  %v326_v55 = vld [vmem:[%s1219_s22 + $0xc0] sm:$0xff]  ;;  %v328_v1 = vld [vmem:[%s1219_s22 + $0xd0] sm:$0xff]  ;;  %v329_v2 = vld [vmem:[%s1219_s22 + $0xd8] sm:$0xff] }
  0x22   : > { %v346_v57 = vpack.c.bf16 %v327_v56, %v326_v55  ;;  %v347_v3 = vpack.c.bf16 %v329_v2, %v328_v1  ;;  %v330_v11 = vld [vmem:[%s1219_s22 + $0xe0] sm:$0xff]  ;;  %v331_v12 = vld [vmem:[%s1219_s22 + $0xe8] sm:$0xff]  ;;  %v332_v21 = vld [vmem:[%s1219_s22 + $0xf0] sm:$0xff] }
  0x23   : > { %627 = vmatpush.bf16.msra.mxu1 %v991_v23  ;;  %1000 = vmatpush.bf16.msra.mxu2 %v991_v23  ;;  %v333_v22 = vld [vmem:[%s1219_s22 + $0xf8] sm:$0xff]  ;;  %s1070_s22 = scalar_lea.hbm %s1069_s30, 2 }
  0x24   : > { %v349_v23 = vpack.c.bf16 %v333_v22, %v332_v21  ;;  %p1071_p11 = scmp.ne.s32.totalorder %s1069_s30, %s1070_s22  ;;  %p1076_p1 = scmp.lt.s32.totalorder %s1074_s14, %s1070_s22 }
  0x26   : > { %p1072_p12 = pnand %p1071_p11, %p1199_p5  ;;  %p1077_p2 = por %p1076_p1, %p1075_p0 }
  0x27   : > { %628 = vmatpush.bf16.msra.mxu1 %v990_v26  ;;  %1001 = vmatpush.bf16.msra.mxu2 %v990_v26 }
  0x28   : > { %p1073_p13 = pneg %p1072_p12 }
  0x2a   : > { %p1078_p3 = pnand %p1077_p2, %p1073_p13 }
  0x2b   : > { %629 = vmatpush.bf16.msra.mxu1 %v989_v28  ;;  %1002 = vmatpush.bf16.msra.mxu2 %v989_v28 }
  0x2d   : > { %932 = vmatmul.msk.bf16.gmra.mxu0 %vm370_vm0, %v335_v7 }
  0x2f   : > { %630 = vmatpush.bf16.msra.mxu1 %v988_v29  ;;  %1003 = vmatpush.bf16.msra.mxu2 %v988_v29 }
  0x31   : > { %942 = vmatmul.msk.bf16.gmra.mxu3 %vm370_vm0, %v345_v44 }
  0x33   : > { %631 = vmatpush.bf16.msra.mxu1 %v987_v30  ;;  %1004 = vmatpush.bf16.msra.mxu2 %v987_v30 }
  0x3d   : > { %933 = vmatmul.msk.bf16.gmra.mxu0 %vm370_vm0, %v336_v10 }
  0x41   : > { %943 = vmatmul.msk.bf16.gmra.mxu3 %vm370_vm0, %v346_v57 }
  0x4d   : > { %934 = vmatmul.msk.bf16.gmra.mxu0 %vm370_vm0, %v337_v13  ;;  %v348_v13 = vpack.c.bf16 %v331_v12, %v330_v11 }
  0x51   : > { %944 = vmatmul.msk.bf16.gmra.mxu3 %vm370_vm0, %v347_v3 }
  0x5d   : > { %935 = vmatmul.msk.bf16.gmra.mxu0 %vm370_vm0, %v338_v16 }
  0x61   : > { %945 = vmatmul.msk.bf16.gmra.mxu3 %vm370_vm0, %v348_v13 }
  0x6d   : > { %936 = vmatmul.msk.bf16.gmra.mxu0 %vm370_vm0, %v339_v20 }
  0x71   : > { %946 = vmatmul.msk.bf16.gmra.mxu3 %vm370_vm0, %v349_v23 }
  0x7d   : > { %937 = vmatmul.msk.bf16.gmra.mxu0 %vm370_vm0, %v340_v27 }
  0x8d   : > { %938 = vmatmul.msk.bf16.gmra.mxu0 %vm370_vm0, %v341_v33 }
  0x9a   : > { %v428_v40 = vpop.f32.mrf.mxu0 }
  0x9b   : > { %v429_v45 = vadd.f32 %v1279_v43, %v428_v40 }
  0x9d   : > { %939 = vmatmul.msk.bf16.gmra.mxu0 %vm370_vm0, %v342_v39  ;;  %v508_v48 = vmax.f32 %v429_v45, 0.0 }
  0xa2   : > { %v430_v46 = vpop.f32.mrf.mxu0 }
  0xa3   : > { %v431_v47 = vadd.f32 %v1279_v43, %v430_v46 }
  0xa5   : > { %v509_v49 = vmax.f32 %v431_v47, 0.0 }
  0xa7   : > { %v540_v52 = vpack.c.bf16 %v509_v49, %v508_v48 }
  0xa9   : > { %632 = vmatmul.bf16.vlgmr.msra.gmra.mxu1 %v540_v52 }
  0xaa   : > { %v433_v54 = vpop.f32.mrf.mxu0 }
  0xab   : > { %v434_v58 = vadd.f32 %v1279_v43, %v433_v54 }
  0xad   : > { %940 = vmatmul.msk.bf16.gmra.mxu0 %vm370_vm0, %v343_v53  ;;  %v510_v61 = vmax.f32 %v434_v58, 0.0  ;;  %v478_v53 = vpop.f32.mrf.mxu3 }
  0xb2   : > { %v435_v59 = vpop.f32.mrf.mxu0 }
  0xb3   : > { %v436_v60 = vadd.f32 %v1279_v43, %v435_v59 }
  0xb5   : > { %v511_v62 = vmax.f32 %v436_v60, 0.0 }
  0xb7   : > { %v541_v63 = vpack.c.bf16 %v511_v62, %v510_v61  ;;  %v480_v61 = vpop.f32.mrf.mxu3  ;;  %v1319_v62 = vld [vmem:[%s1428_s4] ss:$0 sm:$0xff] }
  0xb9   : > { %637 = vmatmul.bf16.gmra.mxu1 %v541_v63 }
  0xba   : > { %v438_v0 = vpop.f32.mrf.mxu0 }
  0xbb   : > { %v439_v4 = vadd.f32 %v1279_v43, %v438_v0 }
  0xbd   : > { %v512_v7 = vmax.f32 %v439_v4, 0.0 }
  0xc2   : > { %v440_v5 = vpop.f32.mrf.mxu0 }
  0xc3   : > { %v441_v6 = vadd.f32 %v1279_v43, %v440_v5 }
  0xc5   : > { %v513_v8 = vmax.f32 %v441_v6, 0.0 }
  0xc7   : > { %v542_v9 = vpack.c.bf16 %v513_v8, %v512_v7  ;;  %v483_v7 = vpop.f32.mrf.mxu3 }
  0xc9   : > { %642 = vmatmul.bf16.gmra.mxu1 %v542_v9 }
  0xca   : > { %v443_v10 = vpop.f32.mrf.mxu0 }
  0xcb   : > { %v444_v14 = vadd.f32 %v1279_v43, %v443_v10 }
  0xcd   : > { %v514_v17 = vmax.f32 %v444_v14, 0.0 }
  0xcf   : > { %v485_v14 = vpop.f32.mrf.mxu3 }
  0xd2   : > { %v445_v15 = vpop.f32.mrf.mxu0 }
  0xd3   : > { %v446_v16 = vadd.f32 %v1279_v43, %v445_v15 }
  0xd5   : > { %v515_v18 = vmax.f32 %v446_v16, 0.0 }
  0xd7   : > { %v543_v19 = vpack.c.bf16 %v515_v18, %v514_v17  ;;  %v479_v17 = vadd.f32 %v1279_v43, %v478_v53  ;;  %v481_v18 = vadd.f32 %v1279_v43, %v480_v61 }
  0xd9   : > { %647 = vmatmul.bf16.gmra.mxu1 %v543_v19  ;;  %v528_v22 = vmax.f32 %v479_v17, 0.0  ;;  %v529_v23 = vmax.f32 %v481_v18, 0.0 }
  0xda   : > { %v448_v20 = vpop.f32.mrf.mxu0 }
  0xdb   : > { %v449_v24 = vadd.f32 %v1279_v43, %v448_v20 }
  0xdd   : > { %v516_v27 = vmax.f32 %v449_v24, 0.0 }
  0xe2   : > { %v450_v25 = vpop.f32.mrf.mxu0 }
  0xe3   : > { %v451_v26 = vadd.f32 %v1279_v43, %v450_v25 }
  0xe5   : > { %v517_v28 = vmax.f32 %v451_v26, 0.0  ;;  %v488_v26 = vpop.f32.mrf.mxu3 }
  0xe7   : > { %v544_v29 = vpack.c.bf16 %v517_v28, %v516_v27  ;;  %v550_v27 = vpack.c.bf16 %v529_v23, %v528_v22 }
  0xe9   : > { %652 = vmatmul.bf16.gmra.mxu1 %v544_v29 }
  0xea   : > { %v453_v30 = vpop.f32.mrf.mxu0 }
  0xeb   : > { %v454_v31 = vadd.f32 %v1279_v43, %v453_v30  ;;  %v484_v30 = vadd.f32 %v1279_v43, %v483_v7 }
  0xed   : > { %v518_v34 = vmax.f32 %v454_v31, 0.0  ;;  %v486_v31 = vadd.f32 %v1279_v43, %v485_v14 }
  0xf2   : > { %v455_v32 = vpop.f32.mrf.mxu0 }
  0xf3   : > { %v456_v33 = vadd.f32 %v1279_v43, %v455_v32 }
  0xf5   : > { %v519_v35 = vmax.f32 %v456_v33, 0.0  ;;  %v490_v33 = vpop.f32.mrf.mxu3 }
  0xf7   : > { %v545_v36 = vpack.c.bf16 %v519_v35, %v518_v34 }
  0xf9   : > { %657 = vmatmul.bf16.gmra.mxu1 %v545_v36  ;;  %v530_v36 = vmax.f32 %v484_v30, 0.0 }
  0xfa   : > { %v458_v37 = vpop.f32.mrf.mxu0 }
  0xfb   : > { %v459_v38 = vadd.f32 %v1279_v43, %v458_v37  ;;  %v531_v37 = vmax.f32 %v486_v31, 0.0 }
  0xfd   : > { %v520_v41 = vmax.f32 %v459_v38, 0.0 }
 0x102   : > { %v460_v39 = vpop.f32.mrf.mxu0 }
 0x103   : > { %v461_v40 = vadd.f32 %v1279_v43, %v460_v39 }
 0x105   : > { %v521_v42 = vmax.f32 %v461_v40, 0.0  ;;  %v551_v40 = vpack.c.bf16 %v531_v37, %v530_v36 }
 0x107   : > { %v546_v44 = vpack.c.bf16 %v521_v42, %v520_v41  ;;  %v493_v41 = vpop.f32.mrf.mxu3 }
 0x109   : > { %662 = vmatmul.bf16.gmra.mxu1 %v546_v44 }
 0x10a   : > { %v463_v45 = vpop.f32.mrf.mxu0 }
 0x10b   : > { %v464_v46 = vadd.f32 %v1279_v43, %v463_v45  ;;  %v489_v45 = vadd.f32 %v1279_v43, %v488_v26 }
 0x10d   : > { %v522_v49 = vmax.f32 %v464_v46, 0.0  ;;  %v491_v46 = vadd.f32 %v1279_v43, %v490_v33 }
 0x10f   : > { %v495_v53 = vpop.f32.mrf.mxu3 }
 0x112   : > { %v465_v47 = vpop.f32.mrf.mxu0 }
 0x113   : > { %v466_v48 = vadd.f32 %v1279_v43, %v465_v47 }
 0x115   : > { %v523_v50 = vmax.f32 %v466_v48, 0.0 }
 0x117   : > { %v547_v51 = vpack.c.bf16 %v523_v50, %v522_v49  ;;  %v532_v50 = vmax.f32 %v489_v45, 0.0 }
 0x119   : > { %667 = vmatmul.bf16.gmra.mxu1 %v547_v51  ;;  %v533_v51 = vmax.f32 %v491_v46, 0.0 }
 0x11a   : > { %v468_v52 = vpop.f32.mrf.mxu0 }
 0x11b   : > { %v469_v54 = vadd.f32 %v1279_v43, %v468_v52 }
 0x11d   : > { %v524_v57 = vmax.f32 %v469_v54, 0.0 }
 0x122   : > { %v470_v55 = vpop.f32.mrf.mxu0 }
 0x123   : > { %v471_v56 = vadd.f32 %v1279_v43, %v470_v55  ;;  %v552_v55 = vpack.c.bf16 %v533_v51, %v532_v50 }
 0x125   : > { %v525_v58 = vmax.f32 %v471_v56, 0.0 }
 0x126   : > { %v633_v59 = vpop.f32.mrf.mxu1 }
 0x127   : > { %v548_v60 = vpack.c.bf16 %v525_v58, %v524_v57  ;;  %v634_v0 = vadd.f32 %v1319_v62, %v633_v59  ;;  %v498_v58 = vpop.f32.mrf.mxu3  ;;  %v494_v59 = vadd.f32 %v1279_v43, %v493_v41 }
 0x129   : > { %672 = vmatmul.bf16.gmra.mxu1 %v548_v60  ;;  %v713_v3 = vmax.f32 %v634_v0, 0.0  ;;  %v496_v60 = vadd.f32 %v1279_v43, %v495_v53 }
 0x12a   : > { %v473_v63 = vpop.f32.mrf.mxu0 }
 0x12b   : > { %v474_v4 = vadd.f32 %v1279_v43, %v473_v63 }
 0x12d   : > { %v526_v10 = vmax.f32 %v474_v4, 0.0 }
 0x12e   : > { %v635_v1 = vpop.f32.mrf.mxu1 }
 0x12f   : > { %v636_v2 = vadd.f32 %v1319_v62, %v635_v1  ;;  %v534_v1 = vmax.f32 %v494_v59, 0.0 }
 0x131   : > { %v714_v5 = vmax.f32 %v636_v2, 0.0  ;;  %v535_v2 = vmax.f32 %v496_v60, 0.0 }
 0x132   : > { %v475_v6 = vpop.f32.mrf.mxu0 }
 0x133   : > { %v476_v8 = vadd.f32 %v1279_v43, %v475_v6  ;;  %v1325_v9 = vpack.c.bf16 %v714_v5, %v713_v3  ;;  %v553_v5 = vpack.c.bf16 %v535_v2, %v534_v1  ;;  %v500_v6 = vpop.f32.mrf.mxu3 }
 0x135   : > { %v527_v11 = vmax.f32 %v476_v8, 0.0  ;;  %v499_v8 = vadd.f32 %v1279_v43, %v498_v58 }
 0x136   : > { %v638_v12 = vpop.f32.mrf.mxu1 }
 0x137   : > { %v549_v13 = vpack.c.bf16 %v527_v11, %v526_v10  ;;  %v639_v15 = vadd.f32 %v1319_v62, %v638_v12  ;;  %v501_v10 = vadd.f32 %v1279_v43, %v500_v6  ;;  %v536_v12 = vmax.f32 %v499_v8, 0.0 }
 0x139   : > { %677 = vmatmul.bf16.vlgmr.msra.gmra.mxu2 %v549_v13  ;;  %v715_v20 = vmax.f32 %v639_v15, 0.0  ;;  %v537_v13 = vmax.f32 %v501_v10, 0.0 }
 0x13b   : > { %v503_v11 = vpop.f32.mrf.mxu3  ;;  %v554_v15 = vpack.c.bf16 %v537_v13, %v536_v12 }
 0x13c   : > { %v504_v18 = vadd.f32 %v1279_v43, %v503_v11 }
 0x13e   : > { %v640_v16 = vpop.f32.mrf.mxu1 }
 0x13f   : > { %v641_v19 = vadd.f32 %v1319_v62, %v640_v16 }
 0x141   : > { %v716_v21 = vmax.f32 %v641_v19, 0.0 }
 0x143   : > { %v1331_v24 = vpack.c.bf16 %v716_v21, %v715_v20  ;;  %v505_v16 = vpop.f32.mrf.mxu3  ;;  %v538_v20 = vmax.f32 %v504_v18, 0.0 }
 0x144   : > { %v506_v19 = vadd.f32 %v1279_v43, %v505_v16 }
 0x146   : > { %v643_v25 = vpop.f32.mrf.mxu1  ;;  %v539_v21 = vmax.f32 %v506_v19, 0.0 }
 0x147   : > { %v644_v28 = vadd.f32 %v1319_v62, %v643_v25 }
 0x148   : > { %v555_v23 = vpack.c.bf16 %v539_v21, %v538_v20 }
 0x149   : > { %682 = vmatmul.bf16.gmra.mxu2 %v550_v27  ;;  %v717_v34 = vmax.f32 %v644_v28, 0.0 }
 0x14e   : > { %v645_v29 = vpop.f32.mrf.mxu1 }
 0x14f   : > { %v646_v32 = vadd.f32 %v1319_v62, %v645_v29 }
 0x151   : > { %v718_v35 = vmax.f32 %v646_v32, 0.0 }
 0x153   : > { %v1337_v38 = vpack.c.bf16 %v718_v35, %v717_v34 }
 0x156   : > { %v648_v39 = vpop.f32.mrf.mxu1 }
 0x157   : > { %v649_v42 = vadd.f32 %v1319_v62, %v648_v39 }
 0x159   : > { %687 = vmatmul.bf16.gmra.mxu2 %v551_v40  ;;  %v719_v48 = vmax.f32 %v649_v42, 0.0 }
 0x15e   : > { %v650_v44 = vpop.f32.mrf.mxu1 }
 0x15f   : > { %v651_v47 = vadd.f32 %v1319_v62, %v650_v44 }
 0x161   : > { %v720_v49 = vmax.f32 %v651_v47, 0.0 }
 0x163   : > { %v749_v52 = vpack.c.bf16 %v720_v49, %v719_v48 }
 0x166   : > { %v653_v54 = vpop.f32.mrf.mxu1 }
 0x167   : > { %v654_v56 = vadd.f32 %v1319_v62, %v653_v54 }
 0x169   : > { %692 = vmatmul.bf16.gmra.mxu2 %v552_v55  ;;  %v721_v63 = vmax.f32 %v654_v56, 0.0 }
 0x16e   : > { %v655_v57 = vpop.f32.mrf.mxu1 }
 0x16f   : > { %v656_v61 = vadd.f32 %v1319_v62, %v655_v57 }
 0x171   : > { %v722_v0 = vmax.f32 %v656_v61, 0.0 }
 0x173   : > { %v750_v3 = vpack.c.bf16 %v722_v0, %v721_v63 }
 0x176   : > { %v658_v4 = vpop.f32.mrf.mxu1 }
 0x177   : > { %v659_v36 = vadd.f32 %v1319_v62, %v658_v4 }
 0x179   : > { %697 = vmatmul.bf16.gmra.mxu2 %v553_v5  ;;  %v723_v39 = vmax.f32 %v659_v36, 0.0  ;;  %v789_v36 = vstv %s788_s15 }
 0x17e   : > { %v660_v7 = vpop.f32.mrf.mxu1 }
 0x17f   : > { %v661_v34 = vadd.f32 %v1319_v62, %v660_v7 }
 0x181   : > { %v724_v37 = vmax.f32 %v661_v34, 0.0 }
 0x183   : > { %v751_v40 = vpack.c.bf16 %v724_v37, %v723_v39 }
 0x186   : > { %v663_v14 = vpop.f32.mrf.mxu1 }
 0x187   : > { %v664_v32 = vadd.f32 %v1319_v62, %v663_v14 }
 0x189   : > { %702 = vmatmul.bf16.gmra.mxu2 %v554_v15  ;;  %v725_v43 = vmax.f32 %v664_v32, 0.0 }
 0x18e   : > { %v665_v17 = vpop.f32.mrf.mxu1 }
 0x18f   : > { %v666_v30 = vadd.f32 %v1319_v62, %v665_v17 }
 0x191   : > { %v726_v33 = vmax.f32 %v666_v30, 0.0 }
 0x193   : > { %v752_v35 = vpack.c.bf16 %v726_v33, %v725_v43 }
 0x196   : > { %v668_v22 = vpop.f32.mrf.mxu1 }
 0x197   : > { %v669_v25 = vadd.f32 %v1319_v62, %v668_v22 }
 0x199   : > { %707 = vmatmul.bf16.gmra.mxu2 %v555_v23  ;;  %v727_v28 = vmax.f32 %v669_v25, 0.0 }
 0x19e   : > { %v670_v26 = vpop.f32.mrf.mxu1 }
 0x19f   : > { %v671_v27 = vadd.f32 %v1319_v62, %v670_v26 }
 0x1a1   : > { %v728_v29 = vmax.f32 %v671_v27, 0.0  ;;  %v745_v27 = vld [vmem:[%s1429_s5] sm:$0xf] }
 0x1a3   : > { %v753_v31 = vpack.c.bf16 %v728_v29, %v727_v28 }
 0x1a5   : > { %762 = vmatpush.bf16.xpose.msrb.mxu2 %v753_v31 }
 0x1a6   : > { %v673_v28 = vpop.f32.mrf.mxu1 }
 0x1a7   : > { %v674_v31 = vadd.f32 %v1319_v62, %v673_v28 }
 0x1a9   : > { %v729_v33 = vmax.f32 %v674_v31, 0.0 }
 0x1ad   : > { %763 = vmatpush.bf16.xpose.msrb.mxu2 %v752_v35 }
 0x1ae   : > { %v675_v29 = vpop.f32.mrf.mxu1 }
 0x1af   : > { %v676_v30 = vadd.f32 %v1319_v62, %v675_v29 }
 0x1b1   : > { %v730_v32 = vmax.f32 %v676_v30, 0.0 }
 0x1b3   : > { %v754_v43 = vpack.c.bf16 %v730_v32, %v729_v33 }
 0x1b5   : > { %764 = vmatpush.bf16.xpose.msrb.mxu2 %v751_v40 }
 0x1bc   : > { %v678_v41 = vpop.f32.mrf.mxu2 }
 0x1bd   : > { %765 = vmatpush.bf16.xpose.msrb.mxu2 %v750_v3  ;;  %v679_v42 = vadd.f32 %v1319_v62, %v678_v41 }
 0x1bf   : > { %v731_v46 = vmax.f32 %v679_v42, 0.0 }
 0x1c4   : > { %v680_v44 = vpop.f32.mrf.mxu2 }
 0x1c5   : > { %v681_v45 = vadd.f32 %v1319_v62, %v680_v44  ;;  %766 = vmatpush.bf16.xpose.msrb.mxu2 %v749_v52 }
 0x1c7   : > { %v732_v47 = vmax.f32 %v681_v45, 0.0 }
 0x1c9   : > { %v755_v48 = vpack.c.bf16 %v732_v47, %v731_v46 }
 0x1cc   : > { %v683_v49 = vpop.f32.mrf.mxu2 }
 0x1cd   : > { %767 = vmatpush.bf16.xpose.msrb.mxu2 %v1337_v38  ;;  %v684_v50 = vadd.f32 %v1319_v62, %v683_v49 }
 0x1cf   : > { %v733_v54 = vmax.f32 %v684_v50, 0.0 }
 0x1d4   : > { %v685_v51 = vpop.f32.mrf.mxu2 }
 0x1d5   : > { %v686_v53 = vadd.f32 %v1319_v62, %v685_v51  ;;  %768 = vmatpush.bf16.xpose.msrb.mxu2 %v1331_v24 }
 0x1d7   : > { %v734_v55 = vmax.f32 %v686_v53, 0.0 }
 0x1d9   : > { %v756_v56 = vpack.c.bf16 %v734_v55, %v733_v54 }
 0x1dc   : > { %v688_v57 = vpop.f32.mrf.mxu2 }
 0x1dd   : > { %769 = vmatpush.bf16.xpose.msrb.mxu2 %v1325_v9  ;;  %v689_v52 = vadd.f32 %v1319_v62, %v688_v57 }
 0x1df   : > { %v735_v60 = vmax.f32 %v689_v52, 0.0 }
 0x1e4   : > { %v690_v58 = vpop.f32.mrf.mxu2  ;;  %770 = vmatmul.bf16.vlgmr.msrb.gmra.mxu2 %v745_v27 }
 0x1e5   : > { %v691_v59 = vadd.f32 %v1319_v62, %v690_v58 }
 0x1e7   : > { %v736_v38 = vmax.f32 %v691_v59, 0.0 }
 0x1e9   : > { %v757_v61 = vpack.c.bf16 %v736_v38, %v735_v60 }
 0x1ec   : > { %v693_v63 = vpop.f32.mrf.mxu2 }
 0x1ed   : > { %v694_v0 = vadd.f32 %v1319_v62, %v693_v63  ;;  %v836_v63 = vlaneseq }
 0x1ef   : > { %v737_v2 = vmax.f32 %v694_v0, 0.0  ;;  %vm838_vm10 = vcmp.lt.s32.totalorder %v836_v63, 256 }
 0x1f4   : > { %v695_v1 = vpop.f32.mrf.mxu2 }
 0x1f5   : > { %v696_v24 = vadd.f32 %v1319_v62, %v695_v1 }
 0x1f7   : > { %v738_v3 = vmax.f32 %v696_v24, 0.0 }
 0x1f9   : > { %v758_v4 = vpack.c.bf16 %v738_v3, %v737_v2 }
 0x1fc   : > { %v698_v5 = vpop.f32.mrf.mxu2 }
 0x1fd   : > { %v699_v22 = vadd.f32 %v1319_v62, %v698_v5 }
 0x1ff   : > { %v739_v25 = vmax.f32 %v699_v22, 0.0 }
 0x204   : > { %v700_v6 = vpop.f32.mrf.mxu2 }
 0x205   : > { %v701_v20 = vadd.f32 %v1319_v62, %v700_v6 }
 0x207   : > { %v740_v23 = vmax.f32 %v701_v20, 0.0 }
 0x209   : > { %v759_v26 = vpack.c.bf16 %v740_v23, %v739_v25 }
 0x20c   : > { %v703_v9 = vpop.f32.mrf.mxu2 }
 0x20d   : > { %v704_v17 = vadd.f32 %v1319_v62, %v703_v9 }
 0x20f   : > { %v741_v19 = vmax.f32 %v704_v17, 0.0 }
 0x214   : > { %v705_v7 = vpop.f32.mrf.mxu2 }
 0x215   : > { %v706_v15 = vadd.f32 %v1319_v62, %v705_v7 }
 0x217   : > { %v742_v18 = vmax.f32 %v706_v15, 0.0 }
 0x219   : > { %v760_v21 = vpack.c.bf16 %v742_v18, %v741_v19 }
 0x21c   : > { %v708_v8 = vpop.f32.mrf.mxu2 }
 0x21d   : > { %v709_v10 = vadd.f32 %v1319_v62, %v708_v8 }
 0x21f   : > { %v743_v13 = vmax.f32 %v709_v10, 0.0 }
 0x224   : > { %v710_v11 = vpop.f32.mrf.mxu2 }
 0x225   : > { %v711_v12 = vadd.f32 %v1319_v62, %v710_v11 }
 0x227   : > { %v744_v14 = vmax.f32 %v711_v12, 0.0 }
 0x229   : > { %v761_v16 = vpack.c.bf16 %v744_v14, %v743_v13 }
 0x22b   : > { %775 = vmatpush.bf16.xpose.msrb.mxu3 %v761_v16 }
 0x233   : > { %776 = vmatpush.bf16.xpose.msrb.mxu3 %v760_v21 }
 0x23b   : > { %777 = vmatpush.bf16.xpose.msrb.mxu3 %v759_v26 }
 0x243   : > { %778 = vmatpush.bf16.xpose.msrb.mxu3 %v758_v4 }
 0x24b   : > { %779 = vmatpush.bf16.xpose.msrb.mxu3 %v757_v61 }
 0x253   : > { %780 = vmatpush.bf16.xpose.msrb.mxu3 %v756_v56 }
 0x25b   : > { %781 = vmatpush.bf16.xpose.msrb.mxu3 %v755_v48 }
 0x263   : > { %782 = vmatpush.bf16.xpose.msrb.mxu3 %v754_v43 }
 0x267   : > { %v771_v34 = vpop.f32.mrf.mxu2 }
 0x268   : > { %v790_v37 = vadd.f32 %v789_v36, %v771_v34 }
 0x26a   : > { %783 = vmatmul.bf16.vlgmr.msrb.gmra.mxu3 %v745_v27  ;;  %v979_v39 = vmul.f32 -1.442695, %v790_v37 }
 0x26c   : > { %1046 = vpow2.f32 %v979_v39 }
 0x26f   : > { %v773_v35 = vpop.f32.mrf.mxu2 }
 0x272   : > { %v1047_v40 = vpop.eup %1046 }
 0x273   : > { %v798_v41 = vadd.f32 1.0, %v1047_v40 }
 0x275   : > { %1048 = vrcp.f32 %v798_v41  ;;  %vm805_vm1 = vweird.f32 %v798_v41  ;;  %v811_v57 = vand.u32 2147483648, %v798_v41  ;;  %v809_v59 = vand.u32 2147483647, %v798_v41 }
 0x277   : > { %v812_v0 = vor.u32 1.1754944e-38, %v811_v57  ;;  %vm810_vm7 = vcmp.eq.f32.partialorder %v809_v59, 8.507059e+37 }
 0x27b   : > { %v1049_v46 = vpop.eup %1048 }
 0x27c   : > { %v801_v49 = vmul.f32 %v1049_v46, %v798_v41  ;;  %vm806_vm2 = vweird.f32 %v1049_v46 }
 0x27d   : > { %vm1385_vm4 = vmor %vm805_vm1, %vm806_vm2 }
 0x27e   : > { %v802_v50 = vsub.f32 1.0, %v801_v49 }
 0x280   : > { %v803_v53 = vmul.f32 %v1049_v46, %v802_v50 }
 0x282   : > { %v804_v56 = vadd.f32 %v1049_v46, %v803_v53 }
 0x284   : > { %v808_v24 = vsel %vm1385_vm4, %v1049_v46, %v804_v56 }
 0x285   : > { %v813_v5 = vsel %vm810_vm7, %v812_v0, %v808_v24 }
 0x2ed   : > { %v784_v42 = vpop.f32.mrf.mxu3 }
 0x2ee   : > { %v791_v44 = vadd.f32 %v789_v36, %v784_v42 }
 0x2f0   : > { %v980_v62 = vmul.f32 -1.442695, %v791_v44 }
 0x2f2   : > { %1050 = vpow2.f32 %v980_v62 }
 0x2f5   : > { %v786_v45 = vpop.f32.mrf.mxu3 }
 0x2f8   : > { %v1051_v47 = vpop.eup %1050 }
 0x2f9   : > { %v799_v48 = vadd.f32 1.0, %v1051_v47 }
 0x2fb   : > { %1052 = vrcp.f32 %v799_v48  ;;  %v826_v52 = vand.u32 2147483648, %v799_v48  ;;  %v824_v60 = vand.u32 2147483647, %v799_v48  ;;  %vm820_vm5 = vweird.f32 %v799_v48 }
 0x2fd   : > { %v827_v1 = vor.u32 1.1754944e-38, %v826_v52  ;;  %vm825_vm8 = vcmp.eq.f32.partialorder %v824_v60, 8.507059e+37 }
 0x301   : > { %v1053_v51 = vpop.eup %1052 }
 0x302   : > { %v816_v54 = vmul.f32 %v1053_v51, %v799_v48  ;;  %vm821_vm3 = vweird.f32 %v1053_v51 }
 0x303   : > { %vm822_vm6 = vmor %vm820_vm5, %vm821_vm3 }
 0x304   : > { %v817_v55 = vsub.f32 1.0, %v816_v54 }
 0x306   : > { %v818_v58 = vmul.f32 %v1053_v51, %v817_v55 }
 0x308   : > { %v819_v61 = vadd.f32 %v1053_v51, %v818_v58 }
 0x30a   : > { %v823_v2 = vsel %vm822_vm6, %v1053_v51, %v819_v61 }
 0x30b   : > { %v828_v3 = vsel %vm825_vm8, %v827_v1, %v823_v2 }
 0x30c   : > { %v832_v4 = vrot.slane %v828_v3, 7 }
 0x30e   : > { %v834_v6 = vsel %vm833_vm9, %v813_v5, %v832_v4 }
 0x30f   : > { %840 = vst.msk [vmem:[%s285_s6] sm:$0x3] %vm838_vm10, %v834_v6 }
 0x310   : > { %1081 = shalt.err (!%p1078_p3)
}
 0x311   : > { %1005 = dma.vmem_to_hbm [thread:$0]  (%p1199_p5), %s855_s23, 32, %s857_s24, %s842_s25  }
 0x312 PF: > { %p1011_p4 = scmp.ge.s32.totalorder %s1116_s29, 2  ;;  %s868_s16 = sand.u32 1, %s1104_s26  }
 0x313   : > { %s869_s18 = scalar_lea.sflag [#allocation4], %s868_s16 }
 0x314   : > { %p1008_p7 = pnand %p1011_p4, %p1203_p6 }
 0x316   : > { %p1009_p8 = pneg %p1008_p7 }
 0x318   : > { %1099 = dma.done.wait (%p1009_p8), %s869_s18, 32  }
 0x319   : > { %1101 = vsyncadd (%p1009_p8), %s869_s18, 4294967264  ;;  %p18_p9 = scmp.ge.s32.totalorder %s1186_s8, 4   ;;  %s1436_s26 = smov %s1108_s27 }
 0x31a   : > { %s1437_s27 = smov %s1112_s28  ;;  %s1438_s28 = smov %s1197_s11 }
 0x31b   : > { %s1439_s29 = smov %s1186_s8  ;;  %20 = sbr.rel (!%p18_p9) target bundleno = 5 (0x5), region = 83 }
 0x320   :  { %875 = vsyncpa [#allocation4], 1 }
 0x321   :  { %877 = vsyncpa [#allocation4 + $0x1], 1 }

</bundles_post_ra>
